<compile_context>
chip_gen: v7x
topology: tpu7x:2x2x1
jax: 0.10.0
libtpu: 0.0.40
codegen_flags: <defaults>
</compile_context>

<pallas_src>
import functools

import jax
import jax.numpy as jnp
from jax import lax
from jax.experimental import pallas as pl
from jax.experimental.pallas import tpu as pltpu


def _vmem_limit_bytes():
    """Generation-aware scoped-VMEM budget: ~half of physical VMEM, capped at 64 MiB."""
    try:
        info = pltpu.get_tpu_info()
        phys = getattr(info, "vmem_capacity_bytes", None)
        if phys:
            return int(min(phys // 2, 64 * 1024 * 1024))   # 64 MiB on v5e/v6e, 32 MiB on v7x
    except Exception:
        pass
    return 32 * 1024 * 1024                                # conservative fallback, safe everywhere


# ----------------------- single-pass kernel (whole (C, HW) slab fits VMEM) -----------------------

def _se_single_pass_kernel(x_ref, w1_ref, w2_ref, o_ref, *, inv_hw, nb):
    # x_ref block: (nb, C, HW) in the native NCHW layout — channels on sublanes, spatial on lanes.
    hw = x_ref.shape[-1]
    w1 = w1_ref[...]                                        # (S, C)
    w2 = w2_ref[...]                                        # (C, S)
    ones = jnp.ones((hw, 1), x_ref.dtype)                   # hoisted out of the unrolled loop
    for b in range(nb):                                     # static unroll over the batch sub-block
        x = x_ref[b]                                        # (C, HW) native dtype (no f32 copy of x)
        # Spatial pooling on the MXU with f32 accumulation.
        pooled = jnp.dot(x, ones, preferred_element_type=jnp.float32)                  # (C, 1)
        mean = pooled * inv_hw
        h = jnp.maximum(jnp.dot(w1, mean, preferred_element_type=jnp.float32), 0.0)    # (S, 1)  delta
        s = jnp.dot(w2, h, preferred_element_type=jnp.float32)                         # (C, 1)
        scale = jax.nn.sigmoid(s).astype(x.dtype)                                      # sigma
        o_ref[b] = x * scale                                # (C, 1) lane broadcast, native dtype


# ------------------- two-pass path, pass 1: per-(batch, channel-block) sums ----------------------

def _se_sum_kernel(x_ref, sums_ref, *, hw, tile):
    t = pl.program_id(2)
    n_t = pl.cdiv(hw, tile)                                 # python int (hw, tile are static)

    @pl.when(t == 0)
    def _():
        sums_ref[...] = jnp.zeros_like(sums_ref)

    x = x_ref[0]                                            # (Cblk, tile) native dtype
    ones = jnp.ones((tile, 1), x.dtype)

    if hw % tile == 0:
        sums_ref[0] += jnp.dot(x, ones, preferred_element_type=jnp.float32)
    else:
        rem = hw - (n_t - 1) * tile                         # valid lanes in the last tile

        @pl.when(t != n_t - 1)
        def _():
            sums_ref[0] += jnp.dot(x, ones, preferred_element_type=jnp.float32)

        @pl.when(t == n_t - 1)                              # masking gated to the last tile only
        def _():
            col = lax.broadcasted_iota(jnp.int32, x.shape, 1)
            xm = jnp.where(col < rem, x, jnp.zeros_like(x))
            sums_ref[0] += jnp.dot(xm, ones, preferred_element_type=jnp.float32)


# -------------------------- two-pass path, pass 2: apply per-channel scale -----------------------

def _se_apply_kernel(scale_ref, x_ref, o_ref):
    o_ref[0] = x_ref[0] * scale_ref[0]                      # (Cblk, tile) * (Cblk, 1), native dtype


# ------------------------------------------- wrapper ---------------------------------------------

def squeeze_excitation(x_nchw, w1, w2, *, spatial_tile=None, donate_input=False):
    """SqueezeExcitation forward.

    x_nchw: (N, C, H, W); w1: (S, C) == fc1.weight[:, :, 0, 0]; w2: (C, S) == fc2.weight[:, :, 0, 0].
    `spatial_tile` forces the two-pass tiled path (testing); `donate_input` aliases x to the output.
    """
    N, C, H, W = x_nchw.shape
    S = w1.shape[0]
    HW = H * W
    itemsize = x_nchw.dtype.itemsize

    # Free view — NO transpose passes over x on either side of the kernels.
    x = x_nchw.reshape(N, C, HW)

    vmem_limit = _vmem_limit_bytes()
    weights_bytes = 2 * S * C * w1.dtype.itemsize           # w1 + w2
    # Budget: 2x in + 2x out double-buffered x blocks, double-buffered weights, 1/5 slack.
    single_block_budget = max(0, vmem_limit - 2 * weights_bytes) // 5
    per_batch_bytes = C * HW * itemsize

    if spatial_tile is None and 0 < per_batch_bytes <= single_block_budget:
        # ------------- single-pass fast path: x read once, written once -------------
        nb = int(max(1, min(N, 8, single_block_budget // per_batch_bytes)))
        out = pl.pallas_call(
            functools.partial(_se_single_pass_kernel, inv_hw=1.0 / HW, nb=nb),
            out_shape=jax.ShapeDtypeStruct((N, C, HW), x.dtype),
            grid_spec=pltpu.PrefetchScalarGridSpec(
                num_scalar_prefetch=0,
                grid=(pl.cdiv(N, nb),),
                in_specs=[
                    pl.BlockSpec((nb, C, HW), lambda i: (i, 0, 0)),
                    pl.BlockSpec((S, C), lambda i: (0, 0)),      # small resident weights
                    pl.BlockSpec((C, S), lambda i: (0, 0)),
                ],
                out_specs=pl.BlockSpec((nb, C, HW), lambda i: (i, 0, 0)),
            ),
            compiler_params=pltpu.CompilerParams(
                dimension_semantics=("parallel",),
                vmem_limit_bytes=vmem_limit,
            ),
            cost_estimate=pl.CostEstimate(
                flops=int(3 * N * HW * C + 4 * N * C * S),
                transcendentals=int(N * C),
                bytes_accessed=int(2 * N * HW * C * itemsize + 2 * weights_bytes),
            ),
            input_output_aliases=({0: 0} if donate_input else {}),
        )(x, w1, w2)
        return out.reshape(N, C, H, W)

    # ------------- two-pass spatially-tiled path: VMEM bounded independent of H*W -------------
    sub = 8 * max(1, 4 // itemsize)                          # sublane packing: 8 f32 / 16 bf16 / 32 int8
    if C >= 2 * sub:
        # Two "parallel" channel blocks so pass 1 keeps both v7x TensorCores busy even at N=1.
        cblk = ((C + 1) // 2 + sub - 1) // sub * sub
    else:
        cblk = C
    CB = pl.cdiv(C, cblk)

    tiled_block_bytes = min(max(2 << 20, vmem_limit // 12), 8 << 20)
    if spatial_tile is not None:
        tile = int(spatial_tile)
    else:
        tile = tiled_block_bytes // max(1, cblk * itemsize)
    if HW <= 128 or tile >= HW:
        tile = HW
    else:
        tile = max(128, (tile // 128) * 128)                 # lane-dim blocks must be 128-multiples
    T = pl.cdiv(HW, tile)

    # Pass 1: per-(batch, channel-block) spatial sums.  No weights in the streaming pass;
    # accumulation goes directly into the resident f32 output block (no scratch needed).
    sums = pl.pallas_call(
        functools.partial(_se_sum_kernel, hw=HW, tile=tile),
        out_shape=jax.ShapeDtypeStruct((N, C, 1), jnp.float32),
        grid_spec=pltpu.PrefetchScalarGridSpec(
            num_scalar_prefetch=0,
            grid=(N, CB, T),
            in_specs=[pl.BlockSpec((1, cblk, tile), lambda b, cb, t: (b, cb, t))],
            out_specs=pl.BlockSpec((1, cblk, 1), lambda b, cb, t: (b, cb, 0)),
        ),
        compiler_params=pltpu.CompilerParams(
            dimension_semantics=("parallel", "parallel", "arbitrary"),
            vmem_limit_bytes=vmem_limit,
        ),
        cost_estimate=pl.CostEstimate(
            flops=int(2 * N * HW * C),
            transcendentals=0,
            bytes_accessed=int(N * HW * C * itemsize + N * C * 4),
        ),
    )(x)

    # Excitation MLP once, batched over N, in plain JAX (tiny: (N,C)@(C,S) and (N,S)@(S,C)).
    mean = sums[:, :, 0] * (1.0 / HW)                                            # (N, C) f32
    h = jnp.maximum(jnp.einsum("nc,sc->ns", mean, w1.astype(jnp.float32)), 0.0)  # ReLU (delta)
    scale = jax.nn.sigmoid(jnp.einsum("ns,cs->nc", h, w2.astype(jnp.float32)))   # Sigmoid (sigma)
    scale = scale.astype(x.dtype)[:, :, None]                                    # (N, C, 1)

    # Pass 2: stream the same tiles and apply the per-channel scale (fully parallel grid).
    out = pl.pallas_call(
        _se_apply_kernel,
        out_shape=jax.ShapeDtypeStruct((N, C, HW), x.dtype),
        grid_spec=pltpu.PrefetchScalarGridSpec(
            num_scalar_prefetch=0,
            grid=(N, CB, T),
            in_specs=[
                pl.BlockSpec((1, cblk, 1), lambda b, cb, t: (b, cb, 0)),
                pl.BlockSpec((1, cblk, tile), lambda b, cb, t: (b, cb, t)),
            ],
            out_specs=pl.BlockSpec((1, cblk, tile), lambda b, cb, t: (b, cb, t)),
        ),
        compiler_params=pltpu.CompilerParams(
            dimension_semantics=("parallel", "parallel", "parallel"),
            vmem_limit_bytes=vmem_limit,
        ),
        cost_estimate=pl.CostEstimate(
            flops=int(N * HW * C),
            transcendentals=0,
            bytes_accessed=int(2 * N * HW * C * itemsize + N * C * itemsize),
        ),
        input_output_aliases=({1: 0} if donate_input else {}),
    )(scale, x)
    return out.reshape(N, C, H, W)


# ------------------------------------------ reference --------------------------------------------

def se_reference(x_nchw, w1, w2):
    xf = x_nchw.astype(jnp.float32)
    pooled = jnp.mean(xf, axis=(2, 3))                                    # (N, C)
    h = jnp.maximum(pooled @ w1.astype(jnp.float32).T, 0.0)               # (N, S)
    scale = jax.nn.sigmoid(h @ w2.astype(jnp.float32).T)                  # (N, C)
    return xf * scale[:, :, None, None]


if __name__ == "__main__":
    key = jax.random.PRNGKey(0)
    kx, k1, k2, kx2, k3, k4 = jax.random.split(key, 6)

    # Small shapes consistent with the module: N=2, 4 input channels, 2 squeeze channels, 16x16.
    N, C, S, H, W = 2, 4, 2, 16, 16
    x = jax.random.normal(kx, (N, C, H, W), dtype=jnp.float32)
    w1 = jax.random.normal(k1, (S, C), dtype=jnp.float32) * 0.5           # fc1.weight[:, :, 0, 0]
    w2 = jax.random.normal(k2, (C, S), dtype=jnp.float32) * 0.5           # fc2.weight[:, :, 0, 0]

    ref = se_reference(x, w1, w2)

    # 1) default single-pass fast path (NCHW handled natively, no transposes)
    out = jax.block_until_ready(squeeze_excitation(x, w1, w2))
    assert out.shape == x.shape and out.dtype == x.dtype
    assert jnp.allclose(out, ref, atol=1e-4, rtol=1e-4), "single-pass mismatch vs reference"

    # 2) forced two-pass spatially-tiled path (even 128-lane tiles)
    out2 = jax.block_until_ready(squeeze_excitation(x, w1, w2, spatial_tile=128))
    assert jnp.allclose(out2, ref, atol=1e-4, rtol=1e-4), "two-pass mismatch vs reference"

    # 3) forced two-pass, ragged (masked) last spatial tile + channel-block split at batch 1
    Cb, Sb = 32, 8
    xr = jax.random.normal(kx2, (1, Cb, 12, 12), dtype=jnp.float32)       # HW=144 -> tiles 128 + 16
    w1b = jax.random.normal(k3, (Sb, Cb), dtype=jnp.float32) * 0.5
    w2b = jax.random.normal(k4, (Cb, Sb), dtype=jnp.float32) * 0.5
    out3 = jax.block_until_ready(squeeze_excitation(xr, w1b, w2b, spatial_tile=128))
    ref3 = se_reference(xr, w1b, w2b)
    assert jnp.allclose(out3, ref3, atol=1e-4, rtol=1e-4), "ragged two-pass mismatch vs reference"

    # 4) bf16 I/O: f32 accumulation in-kernel, multiply/store in bf16 — both paths
    xb = x.astype(jnp.bfloat16)
    refb = se_reference(xb, w1, w2)
    outb = jax.block_until_ready(squeeze_excitation(xb, w1, w2))
    assert outb.dtype == jnp.bfloat16
    assert jnp.allclose(outb.astype(jnp.float32), refb, atol=5e-2, rtol=5e-2), "bf16 single-pass mismatch"
    outb2 = jax.block_until_ready(squeeze_excitation(xb, w1, w2, spatial_tile=128))
    assert jnp.allclose(outb2.astype(jnp.float32), refb, atol=5e-2, rtol=5e-2), "bf16 tiled mismatch"

    print("KERNEL_OK")
</pallas_src>

<mosaic_0001>
module attributes {stable_mosaic.version = 11 : i64} {
  func.func @_se_single_pass_kernel(%arg0: i32, %arg1: memref<2x4x256xf32, #tpu.memory_space<vmem>>, %arg2: memref<2x4xf32, #tpu.memory_space<vmem>>, %arg3: memref<4x2xf32, #tpu.memory_space<vmem>>, %arg4: memref<2x4x256xf32, #tpu.memory_space<vmem>>) attributes {dimension_semantics = [#tpu.dimension_semantics<parallel>], iteration_bounds = array<i64: 1>, scalar_prefetch = 0 : i64, scratch_operands = 0 : i64, tpu.core_type = #tpu.core_type<tc>, window_params = [{transform_indices = @transform_0, window_bounds = array<i64: 2, 4, 256>}, {pipeline_mode = #tpu.pipeline_mode<synchronous>, transform_indices = @transform_1, window_bounds = array<i64: 2, 4>}, {pipeline_mode = #tpu.pipeline_mode<synchronous>, transform_indices = @transform_2, window_bounds = array<i64: 4, 2>}, {transform_indices = @transform_3, window_bounds = array<i64: 2, 4, 256>}]} {
    %c0 = arith.constant 0 : index
    %c0_0 = arith.constant 0 : index
    %0 = vector.load %arg2[%c0, %c0_0] : memref<2x4xf32, #tpu.memory_space<vmem>>, vector<2x4xf32>
    %c0_1 = arith.constant 0 : index
    %c0_2 = arith.constant 0 : index
    %1 = vector.load %arg3[%c0_1, %c0_2] : memref<4x2xf32, #tpu.memory_space<vmem>>, vector<4x2xf32>
    %cst = arith.constant 1.000000e+00 : f32
    %2 = vector.broadcast %cst : f32 to vector<256x1xf32>
    %c0_3 = arith.constant 0 : index
    %c0_4 = arith.constant 0 : index
    %c0_5 = arith.constant 0 : index
    %3 = vector.load %arg1[%c0_3, %c0_4, %c0_5] : memref<2x4x256xf32, #tpu.memory_space<vmem>>, vector<1x4x256xf32>
    %4 = vector.shape_cast %3 : vector<1x4x256xf32> to vector<4x256xf32>
    %cst_6 = arith.constant dense<0.000000e+00> : vector<4x1xf32>
    %5 = tpu.matmul %4, %2, %cst_6 {dimension_numbers = #tpu.dot_dimension_numbers<[1], [0], [0], [1], [0, 0, 1, 1], [], []>} : vector<4x256xf32>, vector<256x1xf32>, vector<4x1xf32> -> vector<4x1xf32>
    %cst_7 = arith.constant 3.906250e-03 : f32
    %6 = vector.broadcast %cst_7 : f32 to vector<4x1xf32>
    %7 = arith.mulf %5, %6 : vector<4x1xf32>
    %cst_8 = arith.constant dense<0.000000e+00> : vector<2x1xf32>
    %8 = tpu.matmul %0, %7, %cst_8 {dimension_numbers = #tpu.dot_dimension_numbers<[1], [0], [0], [1], [0, 0, 1, 1], [], []>} : vector<2x4xf32>, vector<4x1xf32>, vector<2x1xf32> -> vector<2x1xf32>
    %cst_9 = arith.constant 0.000000e+00 : f32
    %9 = vector.broadcast %cst_9 : f32 to vector<2x1xf32>
    %10 = arith.maximumf %8, %9 : vector<2x1xf32>
    %cst_10 = arith.constant dense<0.000000e+00> : vector<4x1xf32>
    %11 = tpu.matmul %1, %10, %cst_10 {dimension_numbers = #tpu.dot_dimension_numbers<[1], [0], [0], [1], [0, 0, 1, 1], [], []>} : vector<4x2xf32>, vector<2x1xf32>, vector<4x1xf32> -> vector<4x1xf32>
    %12 = arith.negf %11 : vector<4x1xf32>
    %13 = math.exp %12 : vector<4x1xf32>
    %cst_11 = arith.constant 1.000000e+00 : f32
    %14 = vector.broadcast %cst_11 : f32 to vector<4x1xf32>
    %15 = arith.addf %14, %13 : vector<4x1xf32>
    %16 = arith.divf %14, %15 : vector<4x1xf32>
    %17 = vector.broadcast %16 : vector<4x1xf32> to vector<4x256xf32>
    %18 = arith.mulf %4, %17 : vector<4x256xf32>
    %c0_12 = arith.constant 0 : index
    %c0_13 = arith.constant 0 : index
    %c0_14 = arith.constant 0 : index
    %19 = vector.load %arg4[%c0_12, %c0_13, %c0_14] : memref<2x4x256xf32, #tpu.memory_space<vmem>>, vector<1x4x256xf32>
    %20 = vector.shape_cast %19 : vector<1x4x256xf32> to vector<4x256xf32>
    %21 = vector.shape_cast %18 : vector<4x256xf32> to vector<1x4x256xf32>
    tpu.vector_store %arg4[%c0_12, %c0_13, %c0_14], %21 {strides = array<i32>} : memref<2x4x256xf32, #tpu.memory_space<vmem>>, vector<1x4x256xf32>,
    %c1 = arith.constant 1 : index
    %c0_15 = arith.constant 0 : index
    %c0_16 = arith.constant 0 : index
    %22 = vector.load %arg1[%c1, %c0_15, %c0_16] : memref<2x4x256xf32, #tpu.memory_space<vmem>>, vector<1x4x256xf32>
    %23 = vector.shape_cast %22 : vector<1x4x256xf32> to vector<4x256xf32>
    %cst_17 = arith.constant dense<0.000000e+00> : vector<4x1xf32>
    %24 = tpu.matmul %23, %2, %cst_17 {dimension_numbers = #tpu.dot_dimension_numbers<[1], [0], [0], [1], [0, 0, 1, 1], [], []>} : vector<4x256xf32>, vector<256x1xf32>, vector<4x1xf32> -> vector<4x1xf32>
    %cst_18 = arith.constant 3.906250e-03 : f32
    %25 = vector.broadcast %cst_18 : f32 to vector<4x1xf32>
    %26 = arith.mulf %24, %25 : vector<4x1xf32>
    %cst_19 = arith.constant dense<0.000000e+00> : vector<2x1xf32>
    %27 = tpu.matmul %0, %26, %cst_19 {dimension_numbers = #tpu.dot_dimension_numbers<[1], [0], [0], [1], [0, 0, 1, 1], [], []>} : vector<2x4xf32>, vector<4x1xf32>, vector<2x1xf32> -> vector<2x1xf32>
    %cst_20 = arith.constant 0.000000e+00 : f32
    %28 = vector.broadcast %cst_20 : f32 to vector<2x1xf32>
    %29 = arith.maximumf %27, %28 : vector<2x1xf32>
    %cst_21 = arith.constant dense<0.000000e+00> : vector<4x1xf32>
    %30 = tpu.matmul %1, %29, %cst_21 {dimension_numbers = #tpu.dot_dimension_numbers<[1], [0], [0], [1], [0, 0, 1, 1], [], []>} : vector<4x2xf32>, vector<2x1xf32>, vector<4x1xf32> -> vector<4x1xf32>
    %31 = arith.negf %30 : vector<4x1xf32>
    %32 = math.exp %31 : vector<4x1xf32>
    %cst_22 = arith.constant 1.000000e+00 : f32
    %33 = vector.broadcast %cst_22 : f32 to vector<4x1xf32>
    %34 = arith.addf %33, %32 : vector<4x1xf32>
    %35 = arith.divf %33, %34 : vector<4x1xf32>
    %36 = vector.broadcast %35 : vector<4x1xf32> to vector<4x256xf32>
    %37 = arith.mulf %23, %36 : vector<4x256xf32>
    %c1_23 = arith.constant 1 : index
    %c0_24 = arith.constant 0 : index
    %c0_25 = arith.constant 0 : index
    %38 = vector.load %arg4[%c1_23, %c0_24, %c0_25] : memref<2x4x256xf32, #tpu.memory_space<vmem>>, vector<1x4x256xf32>
    %39 = vector.shape_cast %38 : vector<1x4x256xf32> to vector<4x256xf32>
    %40 = vector.shape_cast %37 : vector<4x256xf32> to vector<1x4x256xf32>
    tpu.vector_store %arg4[%c1_23, %c0_24, %c0_25], %40 {strides = array<i32>} : memref<2x4x256xf32, #tpu.memory_space<vmem>>, vector<1x4x256xf32>,
    return
  }
  func.func @transform_0(%arg0: i32) -> (i32, i32, i32) {
    %c0_i32 = arith.constant 0 : i32
    %c0_i32_0 = arith.constant 0 : i32
    %c0_i32_1 = arith.constant 0 : i32
    return %arg0, %c0_i32, %c0_i32_0 : i32, i32, i32
  }
  func.func @transform_1(%arg0: i32) -> (i32, i32) {
    %c0_i32 = arith.constant 0 : i32
    %c0_i32_0 = arith.constant 0 : i32
    %c0_i32_1 = arith.constant 0 : i32
    return %c0_i32, %c0_i32_0 : i32, i32
  }
  func.func @transform_2(%arg0: i32) -> (i32, i32) {
    %c0_i32 = arith.constant 0 : i32
    %c0_i32_0 = arith.constant 0 : i32
    %c0_i32_1 = arith.constant 0 : i32
    return %c0_i32, %c0_i32_0 : i32, i32
  }
  func.func @transform_3(%arg0: i32) -> (i32, i32, i32) {
    %c0_i32 = arith.constant 0 : i32
    %c0_i32_0 = arith.constant 0 : i32
    %c0_i32_1 = arith.constant 0 : i32
    return %arg0, %c0_i32, %c0_i32_0 : i32, i32, i32
  }
}

</mosaic_0001>

<bundles_post_ra>
// kernel: tpu_custom_call.1
= control target key start
LH: loop header
LB: loop body
LE: loop exit
PB: predicated region body
PF: predicated region fallthrough
CT: control target
= control target key end

     0   :  { %8 = vsyncpa [#allocation3], 0  ;;  %s881_s0 = inlined_call_operand.hbm [shape: f32[2,4,256], index: 0, kind: input, shape index: {}]   ;;  %s882_s1 = inlined_call_operand.vmem [shape: f32[2,4], index: 1, kind: input, shape index: {}]   ;;  %s883_s2 = inlined_call_operand.vmem [shape: f32[4,2], index: 2, kind: input, shape index: {}]   ;;  %s884_s3 = inlined_call_operand.hbm [shape: f32[2,4,256], index: 3, kind: output, shape index: {}]  }
   0x1   :  { %9 = vsyncpa [#allocation4], 0  ;;  %s752_s12 = smov [#allocation2]   ;;  %s704_s16 = scalar_lea.hbm %s881_s0, 256 }
   0x2   :  { %s15_s13 = sshll.u32 %s752_s12, 4  ;;  %p705_p0 = scmp.ne.s32.totalorder %s881_s0, %s704_s16  ;;  %s16_s13 = int_to_ptr.vmem [resolvable:$true] %s15_s13 }
   0x3   :  { %p708_p1 = scmp.lt.u32.totalorder %s704_s16, %s881_s0 }
   0x5   :  { %p710_p2 = pnand %p708_p1, %p705_p0 }
   0x7   :  { %713 = shalt.err (!%p710_p2)
}
   0x8   :  { %s714_s21 = scalar_lea.vmem %s16_s13, 256  ;;  %p719_p4 = scmp.lt.s32.totalorder %s16_s13, %s16_s13 }
   0x9   :  { %p715_p3 = scmp.ne.s32.totalorder %s16_s13, %s714_s21  ;;  %p720_p5 = scmp.lt.s32.totalorder %s714_s21, %s714_s21 }
   0xb   :  { %p721_p6 = por %p720_p5, %p719_p4 }
   0xd   :  { %p722_p7 = pnand %p721_p6, %p715_p3 }
   0xf   :  { %725 = shalt.err (!%p722_p7)
}
  0x10   :  { %s753_s22 = smov 128   ;;  %s754_s23 = smov 8  }
  0x11   :  { %21 = dma.hbm_to_vmem [thread:$0]  %s881_s0, 256, %s16_s13, [#allocation3], %s753_s22, %s753_s22, %s754_s23  }
  0x12   :  { %748 = dma.done.wait [#allocation3], 256  }
  0x13   :  { %749 = vsyncadd [#allocation3], 4294967040  ;;  %v755_v0 = vmov 1.0|1.0   ;;  %v801_v1 = vld [vmem:[#allocation2] sm:$0xff]  ;;  %v756_v3 = vmov 0.0   ;;  %v276_v28 = vlaneseq }
  0x14   :  { %652 = vmatprep.subr.bf16.mxu0 %v755_v0  ;;  %v33_v2 = vcombine.high %v801_v1, %v801_v1  ;;  %632 = vmatprep.subr.mxu1 %v756_v3  ;;  %vm757_vm0 = vmmov 0   ;;  %vm110_vm1 = vcmask 1043456   ;;  %v29_v8 = vld [vmem:[%s882_s1] sm:$0x3]  ;;  %vm106_vm2 = vcmask 31744   ;;  %v831_v9 = vld [vmem:[#allocation2 + $0x8] sm:$0xff] }
  0x15   :  { %653 = vmatpush3.bf16.msra.mxu0 %v755_v0  ;;  %634 = vmatprep.mubr.msk.f32.mxu1 %vm757_vm0, %v756_v3  ;;  %vm189_vm3 = vcmask 1041408   ;;  %v30_v13 = vld [vmem:[%s883_s2] sm:$0xf]  ;;  %vm185_vm4 = vcmask 15360   ;;  %v286_v14 = vcombine.high %v831_v9, %v831_v9  ;;  %v758_v15 = vmov 0   ;;  %s760_s1 = smov [#allocation5]  }
  0x16   :  { %654 = vmatprep.subr.bf16.mxu0 %v755_v0  ;;  %99 = vmatprep.mubr.f32.mxu0 %v33_v2  ;;  %v759_v26 = vmov 839922192   ;;  %v277_v30 = vshrl.u32 %v276_v28, 7  ;;  %s532_s2 = sshll.u32 %s760_s1, 4  ;;  %s533_s2 = int_to_ptr.vmem [resolvable:$true] %s532_s2 }
  0x17   :  { %693 = vset.pattern.permute.xlu0 %v758_v15  ;;  %v274_v27 = vunpack.c.l.s4 %v759_v26  ;;  %s726_s29 = scalar_lea.vmem %s533_s2, 256  ;;  %p731_p9 = scmp.lt.s32.totalorder %s533_s2, %s533_s2 }
  0x18   :  { %p727_p8 = scmp.ne.s32.totalorder %s533_s2, %s726_s29  ;;  %p732_p10 = scmp.lt.s32.totalorder %s726_s29, %s726_s29 }
  0x19   :  { %655 = vmatpush3.bf16.msra.mxu0 %v755_v0  ;;  %v275_v29 = vunpack.c.0.s8 %v274_v27 }
  0x1a   :  { %656 = vmatprep.subr.bf16.mxu0 %v755_v0  ;;  %p733_p11 = por %p732_p10, %p731_p9 }
  0x1b   :  { %v278_v31 = vsub.s32 %v275_v29, %v277_v30 }
  0x1c   :  { %p734_p12 = pnand %p733_p11, %p727_p8 }
  0x1d   :  { %657 = vmatpush3.bf16.msra.mxu0 %v755_v0 }
  0x1e   :  { %658 = vmatprep.subr.bf16.mxu0 %v755_v0 }
  0x21   :  { %659 = vmatpush3.bf16.msra.mxu0 %v755_v0 }
  0x22   :  { %660 = vmatprep.subr.bf16.mxu0 %v755_v0 }
  0x25   :  { %661 = vmatpush3.bf16.msra.mxu0 %v755_v0 }
  0x26   :  { %662 = vmatprep.subr.bf16.mxu0 %v755_v0 }
  0x29   :  { %663 = vmatpush3.bf16.msra.mxu0 %v755_v0 }
  0x2a   :  { %664 = vmatprep.subr.bf16.mxu0 %v755_v0 }
  0x2d   :  { %665 = vmatpush3.bf16.msra.mxu0 %v755_v0 }
  0x2e   :  { %666 = vmatprep.subr.bf16.mxu0 %v755_v0 }
  0x31   :  { %667 = vmatpush3.bf16.msra.mxu0 %v755_v0 }
  0x32   :  { %642 = vmatprep.subr.mxu0 %v756_v3 }
  0x34   :  { %100 = vmatmul.mubr.f32.vlgmr.msra.gmra.mrb[0].mxu0 %v801_v1 }
  0x35   :  { %644 = vmatprep.mubr.msk.f32.mxu0 %vm757_vm0, %v756_v3 }
 0x107   :  { %v586_v4 = vpop.f32.mrb[0].mxu0 }
 0x108   :  { %v587_v5 = vpop.f32.mrb[1].mxu0 }
 0x109   :  { %v588_v6 = vadd.f32 %v587_v5, %v586_v4 }
 0x10b   :  { %v105_v7 = vmul.f32 0.00390625, %v588_v6 }
 0x10d   :  { %633 = vmatpush3.msk.msra.mxu1 %vm110_vm1, %v105_v7 }
 0x10e   :  { %635 = vmatmul.mubr.msk.f32.vlgmr.msra.gmra.mrb[0].mxu1 %vm106_vm2, %v29_v8  ;;  %637 = vmatprep.subr.mxu1 %v756_v3 }
 0x10f   :  { %639 = vmatprep.mubr.msk.f32.mxu1 %vm757_vm0, %v756_v3 }
 0x1e1   :  { %v180_v10 = vpop.f32.mrb[0].mxu1 }
 0x1e2   :  { %v184_v11 = vmax.f32 %v180_v10, 0.0  ;;  %v636_v12 = vpop.f32.mrb[1].mxu1 }
 0x1e4   :  { %638 = vmatpush3.msk.msra.mxu1 %vm189_vm3, %v184_v11 }
 0x1e5   :  { %640 = vmatmul.mubr.msk.f32.vlgmr.msra.gmra.mrb[2].mxu1 %vm185_vm4, %v30_v13  ;;  %668 = vmatprep.subr.bf16.mxu1 %v755_v0 }
 0x1e6   :  { %669 = vmatpush3.bf16.msra.mxu1 %v755_v0  ;;  %352 = vmatprep.mubr.f32.mxu1 %v286_v14 }
 0x1e7   :  { %670 = vmatprep.subr.bf16.mxu1 %v755_v0 }
 0x1ea   :  { %671 = vmatpush3.bf16.msra.mxu1 %v755_v0 }
 0x1eb   :  { %672 = vmatprep.subr.bf16.mxu1 %v755_v0 }
 0x1ee   :  { %673 = vmatpush3.bf16.msra.mxu1 %v755_v0 }
 0x1ef   :  { %674 = vmatprep.subr.bf16.mxu1 %v755_v0 }
 0x1f2   :  { %675 = vmatpush3.bf16.msra.mxu1 %v755_v0 }
 0x1f3   :  { %676 = vmatprep.subr.bf16.mxu1 %v755_v0 }
 0x1f6   :  { %677 = vmatpush3.bf16.msra.mxu1 %v755_v0 }
 0x1f7   :  { %678 = vmatprep.subr.bf16.mxu1 %v755_v0 }
 0x1fa   :  { %679 = vmatpush3.bf16.msra.mxu1 %v755_v0 }
 0x1fb   :  { %680 = vmatprep.subr.bf16.mxu1 %v755_v0 }
 0x1fe   :  { %681 = vmatpush3.bf16.msra.mxu1 %v755_v0 }
 0x1ff   :  { %682 = vmatprep.subr.bf16.mxu1 %v755_v0 }
 0x202   :  { %683 = vmatpush3.bf16.msra.mxu1 %v755_v0 }
 0x205   :  { %353 = vmatmul.mubr.f32.vlgmr.msra.gmra.mrb[4].mxu1 %v831_v9 }
 0x2b8   :  { %v259_v16 = vpop.f32.mrb[2].mxu1 }
 0x2b9   :  { %v548_v17 = vmul.f32 -1.442695, %v259_v16  ;;  %v641_v18 = vpop.f32.mrb[3].mxu1 }
 0x2bb   :  { %696 = vpow2.f32 %v548_v17 }
 0x2c5   :  { %v697_v19 = vpop.eup %696 }
 0x2c6   :  { %v266_v20 = vadd.f32 1.0, %v697_v19 }
 0x2c8   :  { %698 = vrcp.f32 %v266_v20 }
 0x2d2   :  { %v699_v21 = vpop.eup %698 }
 0x2d3   :  { %271 = vperm.xlu0 %693, %v699_v21  }
 0x2d8   :  { %v625_v22 = vpop.f32.mrb[4].mxu1 }
 0x2d9   :  { %v626_v23 = vpop.f32.mrb[5].mxu1 }
 0x2da   :  { %v627_v24 = vadd.f32 %v626_v23, %v625_v22 }
 0x2dc   :  { %v358_v25 = vmul.f32 0.00390625, %v627_v24 }
 0x2de   :  { %643 = vmatpush3.msk.msra.mxu0 %vm110_vm1, %v358_v25 }
 0x2df   :  { %645 = vmatmul.mubr.msk.f32.vlgmr.msra.gmra.mrb[2].mxu0 %vm106_vm2, %v29_v8  ;;  %647 = vmatprep.subr.mxu0 %v756_v3 }
 0x2e0   :  { %649 = vmatprep.mubr.msk.f32.mxu0 %vm757_vm0, %v756_v3 }
 0x352   :  { %v272_v32 = vpop.permute.xlu0 %271 }
 0x353   :  { %v279_v33 = vrot.slane %v272_v32, %v278_v31 }
 0x355   :  { %v281_v34 = vmul.f32 %v279_v33, %v801_v1 }
 0x357   :  { %282 = vst [vmem:[#allocation5] sm:$0xff] %v281_v34 }
 0x3b2   :  { %v428_v35 = vpop.f32.mrb[2].mxu0 }
 0x3b3   :  { %v432_v36 = vmax.f32 %v428_v35, 0.0  ;;  %v646_v37 = vpop.f32.mrb[3].mxu0 }
 0x3b5   :  { %648 = vmatpush3.msk.msra.mxu0 %vm189_vm3, %v432_v36 }
 0x3b6   :  { %650 = vmatmul.mubr.msk.f32.vlgmr.msra.gmra.mrb[4].mxu0 %vm185_vm4, %v30_v13 }
 0x489   :  { %v502_v38 = vpop.f32.mrb[4].mxu0 }
 0x48a   :  { %v553_v39 = vmul.f32 -1.442695, %v502_v38  ;;  %v651_v40 = vpop.f32.mrb[5].mxu0 }
 0x48c   :  { %700 = vpow2.f32 %v553_v39 }
 0x496   :  { %v701_v41 = vpop.eup %700 }
 0x497   :  { %v509_v42 = vadd.f32 1.0, %v701_v41 }
 0x499   :  { %702 = vrcp.f32 %v509_v42 }
 0x4a3   :  { %v703_v43 = vpop.eup %702 }
 0x4a4   :  { %514 = vperm.xlu0 %693, %v703_v43  }
 0x523   :  { %v515_v44 = vpop.permute.xlu0 %514 }
 0x524   :  { %v522_v45 = vrot.slane %v515_v44, %v278_v31 }
 0x526   :  { %v524_v46 = vmul.f32 %v522_v45, %v831_v9 }
 0x528   :  { %526 = vst [vmem:[#allocation5 + $0x8] sm:$0xff] %v524_v46 }
 0x529   :  { %737 = shalt.err (!%p734_p12)
}
 0x52a   :  { %s738_s5 = scalar_lea.hbm %s884_s3, 256 }
 0x52b   :  { %p739_p13 = scmp.ne.s32.totalorder %s884_s3, %s738_s5  ;;  %p742_p0 = scmp.lt.u32.totalorder %s738_s5, %s884_s3 }
 0x52d   :  { %p744_p1 = pnand %p742_p0, %p739_p13 }
 0x52f   :  { %747 = shalt.err (!%p744_p1)
}
 0x530   :  { %538 = dma.vmem_to_hbm [thread:$0]  %s533_s2, 256, %s884_s3, [#allocation4], %s753_s22, %s753_s22, %s754_s23  }
 0x531   :  { %750 = dma.done.wait [#allocation4], 256  }
 0x532   :  { %751 = vsyncadd [#allocation4], 4294967040 }
 0x533   :  { %542 = vsyncpa [#allocation3], 1 }
 0x534   :  { %543 = vsyncpa [#allocation4], 1 }

</bundles_post_ra>
